<compile_context>
chip_gen: v5e
topology: v5e:2x2
jax: 0.10.0
libtpu: 0.0.40
codegen_flags: <defaults>
</compile_context>

<pallas_src>
import math
import functools

import jax
import jax.numpy as jnp
from jax import lax
from jax.experimental import pallas as pl
from jax.experimental.pallas import tpu as pltpu


_VMEM_LIMIT = 48 * 1024 * 1024   # fits v7x's 64 MiB physical VMEM with headroom


def _pick_tile(dim, max_tile, granule):
    """Largest multiple of `granule` that divides `dim` and is <= max_tile.

    Falls back to the full dim (a full-extent block is always legal)."""
    if dim <= max_tile:
        return dim
    best = 0
    t = granule
    while t <= max_tile:
        if dim % t == 0:
            best = t
        t += granule
    return best if best else dim


# ---------------------------------------------------------------------------
# Tiled matmul + bias (used for the QKV projection and the output projection).
# ---------------------------------------------------------------------------
def _matmul_bias_kernel(x_ref, w_ref, b_ref, o_ref, acc_ref):
    k = pl.program_id(2)

    @pl.when(k == 0)
    def _():
        acc_ref[...] = jnp.zeros_like(acc_ref)

    acc_ref[...] += jnp.dot(x_ref[...], w_ref[...],
                            preferred_element_type=jnp.float32)

    @pl.when(k == pl.num_programs(2) - 1)
    def _():
        # Bias added once per output tile (hoisted out of the K reduction loop).
        o_ref[...] = (acc_ref[...] + b_ref[...].astype(jnp.float32)).astype(o_ref.dtype)


def _matmul_bias(x, w, b, *, out_dtype, tm_max=512, tn_max=512, tk_max=512):
    M, K = x.shape
    _, N = w.shape
    tm = _pick_tile(M, tm_max, 8)
    tn = _pick_tile(N, tn_max, 128)
    tk = _pick_tile(K, tk_max, 128)
    grid = (M // tm, N // tn, K // tk)
    return pl.pallas_call(
        _matmul_bias_kernel,
        out_shape=jax.ShapeDtypeStruct((M, N), out_dtype),
        grid=grid,
        in_specs=[
            pl.BlockSpec((tm, tk), lambda i, j, k: (i, k)),   # x tile
            pl.BlockSpec((tk, tn), lambda i, j, k: (k, j)),   # weight tile (streamed)
            pl.BlockSpec((1, tn), lambda i, j, k: (0, j)),    # bias tile
        ],
        out_specs=pl.BlockSpec((tm, tn), lambda i, j, k: (i, j)),
        scratch_shapes=[pltpu.VMEM((tm, tn), jnp.float32)],
        compiler_params=pltpu.CompilerParams(
            dimension_semantics=("parallel", "parallel", "arbitrary"),
            vmem_limit_bytes=_VMEM_LIMIT),
    )(x, w, b)


# ---------------------------------------------------------------------------
# Flash-style causal multi-head attention over a (B*H, S, head_dim) layout.
# ---------------------------------------------------------------------------
def _flash_mha_kernel(q_ref, k_ref, v_ref, o_ref, m_ref, l_ref, acc_ref,
                      *, softmax_scale):
    qi = pl.program_id(1)
    ki = pl.program_id(2)
    tq = q_ref.shape[1]
    tk = k_ref.shape[1]

    @pl.when(ki == 0)
    def _():
        m_ref[...] = jnp.full_like(m_ref, -jnp.inf)
        l_ref[...] = jnp.zeros_like(l_ref)
        acc_ref[...] = jnp.zeros_like(acc_ref)

    q_start = qi * tq
    k_start = ki * tk

    # Causal skip: KV tiles entirely above the diagonal contribute nothing.
    @pl.when(k_start < q_start + tq)
    def _():
        q = q_ref[0]                       # (tq, hd)
        k = k_ref[0]                       # (tk, hd)
        v = v_ref[0]                       # (tk, hd)

        # q @ k^T without materializing a transpose (contract the last dims).
        s = lax.dot_general(q, k, (((1,), (1,)), ((), ())),
                            preferred_element_type=jnp.float32)
        s = s * softmax_scale

        # Per-tile causal mask; masked positions -> f32 min (matches masked_fill).
        row = q_start + lax.broadcasted_iota(jnp.int32, (tq, tk), 0)
        col = k_start + lax.broadcasted_iota(jnp.int32, (tq, tk), 1)
        s = jnp.where(col > row, jnp.finfo(jnp.float32).min, s)

        m_prev = m_ref[...]                                        # (tq, 1)
        m_new = jnp.maximum(m_prev, jnp.max(s, axis=-1, keepdims=True))
        alpha = jnp.exp(m_prev - m_new)                            # (tq, 1)
        p = jnp.exp(s - m_new)                                     # (tq, tk)

        l_ref[...] = alpha * l_ref[...] + jnp.sum(p, axis=-1, keepdims=True)
        acc_ref[...] = alpha * acc_ref[...] + jnp.dot(
            p.astype(v.dtype), v, preferred_element_type=jnp.float32)
        m_ref[...] = m_new

    @pl.when(ki == pl.num_programs(2) - 1)
    def _():
        inv_l = pl.reciprocal(l_ref[...], approx=True)             # EUP, ~free slot
        o_ref[0] = (acc_ref[...] * inv_l).astype(o_ref.dtype)


def _flash_mha(q, k, v, *, softmax_scale, tq_max=512, tk_max=512):
    BH, S, hd = q.shape
    tq = _pick_tile(S, tq_max, 8)
    tk = _pick_tile(S, tk_max, 8)
    grid = (BH, S // tq, S // tk)
    kernel = functools.partial(_flash_mha_kernel, softmax_scale=softmax_scale)
    return pl.pallas_call(
        kernel,
        out_shape=jax.ShapeDtypeStruct((BH, S, hd), q.dtype),
        grid=grid,
        in_specs=[
            pl.BlockSpec((1, tq, hd), lambda b, qi, ki: (b, qi, 0)),  # Q tile
            pl.BlockSpec((1, tk, hd), lambda b, qi, ki: (b, ki, 0)),  # K tile
            pl.BlockSpec((1, tk, hd), lambda b, qi, ki: (b, ki, 0)),  # V tile
        ],
        out_specs=pl.BlockSpec((1, tq, hd), lambda b, qi, ki: (b, qi, 0)),
        scratch_shapes=[
            pltpu.VMEM((tq, 1), jnp.float32),    # running max m
            pltpu.VMEM((tq, 1), jnp.float32),    # running denom l
            pltpu.VMEM((tq, hd), jnp.float32),   # output accumulator
        ],
        compiler_params=pltpu.CompilerParams(
            dimension_semantics=("parallel", "parallel", "arbitrary"),
            vmem_limit_bytes=_VMEM_LIMIT),
    )(q, k, v)


# ---------------------------------------------------------------------------
# Module-level forward.
# ---------------------------------------------------------------------------
def multihead_attention(x, wqkv, bqkv, wout, bout, *, n_heads, compute_dtype=None):
    """MultiheadAttention forward (torch attn path, causal, no mask/bias/dropout).

    compute_dtype: if set (e.g. jnp.bfloat16), x and the weights are cast for the
    MXU matmuls; softmax and all accumulations stay in f32 and the output is
    returned in x's original dtype.
    """
    B, S, D = x.shape
    assert D % n_heads == 0, "d_model must be divisible by n_heads"
    head_dim = D // n_heads
    softmax_scale = 1.0 / math.sqrt(head_dim)
    out_dtype = x.dtype

    if compute_dtype is not None:
        x = x.astype(compute_dtype)
        wqkv = wqkv.astype(compute_dtype)
        wout = wout.astype(compute_dtype)
        # biases stay as-is; the matmul kernel adds them in f32.

    # ---- fused QKV projection: (B*S, D) @ (D, 3D) + b ----
    qkv = _matmul_bias(x.reshape(B * S, D), wqkv, bqkv, out_dtype=x.dtype)
    qkv = qkv.reshape(B, S, 3, n_heads, head_dim)

    # Head-major (B*H, S, hd) layout: heads become a parallel grid axis of the
    # attention kernel (no per-head Python loop, no lane-axis concat in-kernel).
    def to_heads(t):  # (B, S, H, hd) -> (B*H, S, hd)
        return jnp.transpose(t, (0, 2, 1, 3)).reshape(B * n_heads, S, head_dim)

    q = to_heads(qkv[:, :, 0])
    k = to_heads(qkv[:, :, 1])
    v = to_heads(qkv[:, :, 2])

    # ---- flash-style causal attention ----
    ctx = _flash_mha(q, k, v, softmax_scale=softmax_scale)        # (B*H, S, hd)

    # 'b h s d -> b s (h d)'
    ctx = jnp.transpose(ctx.reshape(B, n_heads, S, head_dim), (0, 2, 1, 3))
    ctx = ctx.reshape(B * S, D)

    # ---- output projection ----
    out = _matmul_bias(ctx, wout, bout, out_dtype=out_dtype)
    return out.reshape(B, S, D)


def multihead_attention_ref(x, wqkv, bqkv, wout, bout, *, n_heads):
    """Pure-JAX reference mirroring the PyTorch module (torch attn impl)."""
    B, S, D = x.shape
    hd = D // n_heads
    scale = 1.0 / math.sqrt(hd)
    qkv = x @ wqkv + bqkv[0]
    q, k, v = jnp.split(qkv, 3, axis=-1)

    def heads(t):
        return t.reshape(B, S, n_heads, hd).transpose(0, 2, 1, 3)   # b h s d

    qh, kh, vh = heads(q), heads(k), heads(v)
    s = jnp.einsum('bhqd,bhkd->bhqk', qh, kh) * scale
    mask = jnp.triu(jnp.ones((S, S), bool), 1)
    s = jnp.where(mask[None, None], jnp.finfo(jnp.float32).min, s)
    p = jax.nn.softmax(s, axis=-1)
    ctx = jnp.einsum('bhqk,bhkd->bhqd', p, vh).transpose(0, 2, 1, 3).reshape(B, S, D)
    return ctx @ wout + bout[0]


if __name__ == "__main__":
    # Small shapes consistent with the module: d_model = n_heads * head_dim.
    B, S, D, H = 2, 8, 32, 4
    qkv_dim = 3 * D

    key = jax.random.PRNGKey(0)
    kx, kw1, kb1, kw2, kb2 = jax.random.split(key, 5)

    x = jax.random.normal(kx, (B, S, D), dtype=jnp.float32)
    # Deterministic parameter init (nn.Linear-like uniform ranges), (in, out) layout.
    lim = 1.0 / math.sqrt(D)
    wqkv = jax.random.uniform(kw1, (D, qkv_dim), jnp.float32, -lim, lim)
    bqkv = jax.random.uniform(kb1, (1, qkv_dim), jnp.float32, -lim, lim)
    wout = jax.random.uniform(kw2, (D, D), jnp.float32, -lim, lim)
    bout = jax.random.uniform(kb2, (1, D), jnp.float32, -lim, lim)

    ref = multihead_attention_ref(x, wqkv, bqkv, wout, bout, n_heads=H)

    # f32 path.
    out = multihead_attention(x, wqkv, bqkv, wout, bout, n_heads=H)
    out = jax.block_until_ready(out)
    assert out.shape == (B, S, D)
    # Tolerance accounts for the approximate-reciprocal normalization and the
    # online-softmax accumulation order.
    assert jnp.allclose(out, ref, atol=2e-2, rtol=2e-2), "f32 mismatch vs reference"

    # bf16 compute path (halves HBM/VMEM traffic, full-rate MXU on v6e/v7x).
    out_bf16 = multihead_attention(x, wqkv, bqkv, wout, bout, n_heads=H,
                                   compute_dtype=jnp.bfloat16)
    out_bf16 = jax.block_until_ready(out_bf16)
    assert out_bf16.shape == (B, S, D)
    assert jnp.allclose(out_bf16.astype(jnp.float32), ref, atol=1e-1, rtol=1e-1), \
        "bf16 mismatch vs reference"

    print("KERNEL_OK")
</pallas_src>

<mosaic_0001>
module attributes {stable_mosaic.version = 11 : i64} {
  func.func @_matmul_bias_kernel(%arg0: i32, %arg1: i32, %arg2: i32, %arg3: memref<16x32xf32, #tpu.memory_space<vmem>>, %arg4: memref<32x96xf32, #tpu.memory_space<vmem>>, %arg5: memref<1x96xf32, #tpu.memory_space<vmem>>, %arg6: memref<16x96xf32, #tpu.memory_space<vmem>>, %arg7: memref<16x96xf32, #tpu.memory_space<vmem>>) attributes {dimension_semantics = [#tpu.dimension_semantics<parallel>, #tpu.dimension_semantics<parallel>, #tpu.dimension_semantics<arbitrary>], iteration_bounds = array<i64: 1, 1, 1>, scalar_prefetch = 0 : i64, scratch_operands = 1 : i64, tpu.core_type = #tpu.core_type<tc>, window_params = [{transform_indices = @transform_0, window_bounds = array<i64: 16, 32>}, {transform_indices = @transform_1, window_bounds = array<i64: 32, 96>}, {transform_indices = @transform_2, window_bounds = array<i64: 1, 96>}, {transform_indices = @transform_3, window_bounds = array<i64: 16, 96>}]} {
    %c0_i32 = arith.constant 0 : i32
    %0 = arith.cmpi eq, %arg2, %c0_i32 : i32
    %1 = arith.extui %0 : i1 to i32
    %c0_i32_0 = arith.constant 0 : i32
    %2 = arith.cmpi ne, %1, %c0_i32_0 : i32
    scf.if %2 {
      %cst_10 = arith.constant 0.000000e+00 : f32
      %12 = vector.broadcast %cst_10 : f32 to vector<16x96xf32>
      %c0_11 = arith.constant 0 : index
      %c0_12 = arith.constant 0 : index
      %13 = vector.load %arg7[%c0_11, %c0_12] : memref<16x96xf32, #tpu.memory_space<vmem>>, vector<16x96xf32>
      tpu.vector_store %arg7[%c0_11, %c0_12], %12 {strides = array<i32>} : memref<16x96xf32, #tpu.memory_space<vmem>>, vector<16x96xf32>,
    } else {
    }
    %c0 = arith.constant 0 : index
    %c0_1 = arith.constant 0 : index
    %3 = vector.load %arg7[%c0, %c0_1] : memref<16x96xf32, #tpu.memory_space<vmem>>, vector<16x96xf32>
    %c0_2 = arith.constant 0 : index
    %c0_3 = arith.constant 0 : index
    %4 = vector.load %arg3[%c0_2, %c0_3] : memref<16x32xf32, #tpu.memory_space<vmem>>, vector<16x32xf32>
    %c0_4 = arith.constant 0 : index
    %c0_5 = arith.constant 0 : index
    %5 = vector.load %arg4[%c0_4, %c0_5] : memref<32x96xf32, #tpu.memory_space<vmem>>, vector<32x96xf32>
    %cst = arith.constant dense<0.000000e+00> : vector<16x96xf32>
    %6 = tpu.matmul %4, %5, %cst {dimension_numbers = #tpu.dot_dimension_numbers<[1], [0], [0], [1], [0, 0, 1, 1], [], []>} : vector<16x32xf32>, vector<32x96xf32>, vector<16x96xf32> -> vector<16x96xf32>
    %7 = arith.addf %3, %6 : vector<16x96xf32>
    %c0_6 = arith.constant 0 : index
    %c0_7 = arith.constant 0 : index
    %8 = vector.load %arg7[%c0_6, %c0_7] : memref<16x96xf32, #tpu.memory_space<vmem>>, vector<16x96xf32>
    tpu.vector_store %arg7[%c0_6, %c0_7], %7 {strides = array<i32>} : memref<16x96xf32, #tpu.memory_space<vmem>>, vector<16x96xf32>,
    %c0_i32_8 = arith.constant 0 : i32
    %9 = arith.cmpi eq, %arg2, %c0_i32_8 : i32
    %10 = arith.extui %9 : i1 to i32
    %c0_i32_9 = arith.constant 0 : i32
    %11 = arith.cmpi ne, %10, %c0_i32_9 : i32
    scf.if %11 {
      %c0_10 = arith.constant 0 : index
      %c0_11 = arith.constant 0 : index
      %12 = vector.load %arg7[%c0_10, %c0_11] : memref<16x96xf32, #tpu.memory_space<vmem>>, vector<16x96xf32>
      %c0_12 = arith.constant 0 : index
      %c0_13 = arith.constant 0 : index
      %13 = vector.load %arg5[%c0_12, %c0_13] : memref<1x96xf32, #tpu.memory_space<vmem>>, vector<1x96xf32>
      %14 = vector.broadcast %13 : vector<1x96xf32> to vector<16x96xf32>
      %15 = arith.addf %12, %14 : vector<16x96xf32>
      %c0_14 = arith.constant 0 : index
      %c0_15 = arith.constant 0 : index
      %16 = vector.load %arg6[%c0_14, %c0_15] : memref<16x96xf32, #tpu.memory_space<vmem>>, vector<16x96xf32>
      tpu.vector_store %arg6[%c0_14, %c0_15], %15 {strides = array<i32>} : memref<16x96xf32, #tpu.memory_space<vmem>>, vector<16x96xf32>,
    } else {
    }
    return
  }
  func.func @transform_0(%arg0: i32, %arg1: i32, %arg2: i32) -> (i32, i32) {
    %c0_i32 = arith.constant 0 : i32
    return %arg0, %arg2 : i32, i32
  }
  func.func @transform_1(%arg0: i32, %arg1: i32, %arg2: i32) -> (i32, i32) {
    %c0_i32 = arith.constant 0 : i32
    return %arg2, %arg1 : i32, i32
  }
  func.func @transform_2(%arg0: i32, %arg1: i32, %arg2: i32) -> (i32, i32) {
    %c0_i32 = arith.constant 0 : i32
    %c0_i32_0 = arith.constant 0 : i32
    return %c0_i32, %arg1 : i32, i32
  }
  func.func @transform_3(%arg0: i32, %arg1: i32, %arg2: i32) -> (i32, i32) {
    %c0_i32 = arith.constant 0 : i32
    return %arg0, %arg1 : i32, i32
  }
}

</mosaic_0001>

<bundles_post_ra>
// kernel: tpu_custom_call.1
= control target key start
LH: loop header
LB: loop body
LE: loop exit
PB: predicated region body
PF: predicated region fallthrough
CT: control target
= control target key end

     0   :  { %8 = vsyncpa [#allocation4], 0  ;;  %s274_s0 = inlined_call_operand.hbm [shape: f32[16,32], index: 0, kind: input, shape index: {}]   ;;  %s275_s1 = inlined_call_operand.hbm [shape: f32[32,96], index: 1, kind: input, shape index: {}]   ;;  %s276_s2 = inlined_call_operand.vmem [shape: f32[1,96], index: 2, kind: input, shape index: {}]   ;;  %s277_s3 = inlined_call_operand.hbm [shape: f32[16,96], index: 3, kind: output, shape index: {}]  }
   0x1   :  { %9 = vsyncpa [#allocation7], 0 }
   0x2   :  { %10 = vsyncpa [#allocation5], 0  ;;  %s15_s14 = sshll.u32 %s274_s0, 4  ;;  %s221_s15 = smov [#allocation3]   ;;  %s16_s14 = int_to_ptr.hbm [resolvable:$true] %s15_s14 }
   0x3   :  { %s17_s16 = sshll.u32 %s221_s15, 4  ;;  %s28_s19 = sshll.u32 %s275_s1, 4  ;;  %s18_s16 = int_to_ptr.vmem [resolvable:$true] %s17_s16  ;;  %s29_s19 = int_to_ptr.hbm [resolvable:$true] %s28_s19 }
   0x4   :  { %s222_s20 = smov 128   ;;  %s223_s21 = smov 8  }
   0x5   :  { %23 = dma.hbm_to_vmem [thread:$0]  %s16_s14, 256, %s18_s16, [#allocation4], %s222_s20, %s222_s20, %s223_s21  }
   0x6   :  { %s224_s22 = smov [#allocation6]  }
   0x7   :  { %s30_s23 = sshll.u32 %s224_s22, 4  ;;  %s31_s23 = int_to_ptr.vmem [resolvable:$true] %s30_s23 }
   0x8   :  { %36 = dma.hbm_to_vmem [thread:$0]  %s29_s19, 512, %s31_s23, [#allocation7], %s222_s20, %s222_s20, %s223_s21  }
   0x9   :  { %215 = dma.done.wait [#allocation4], 256  }
   0xa   :  { %216 = vsyncadd [#allocation4], 4294967040 }
   0xb   :  { %217 = dma.done.wait [#allocation7], 512  }
   0xc   :  { %218 = vsyncadd [#allocation7], 4294966784  ;;  %vm51_vm0 = vcmask 785408   ;;  %v225_v0 = vmov 0.0   ;;  %v61_v1 = vld [vmem:[#allocation6 + $0x18] sm:$0xff]  ;;  %v60_v2 = vld [vmem:[#allocation6 + $0x10] sm:$0xff] }
   0xd   :  { %52 = vst.msk [vmem:[#allocation2] sm:$0xff] %vm51_vm0, %v225_v0  ;;  %81 = vmatpush.msra.mxu0 %v61_v1  ;;  %132 = vmatpush.msra.mxu1 %v61_v1  ;;  %v59_v3 = vld [vmem:[#allocation6 + $0x8] sm:$0xff]  ;;  %v58_v4 = vld [vmem:[#allocation6] sm:$0xff]  ;;  %v56_v5 = vld [vmem:[#allocation3] sm:$0xff]  ;;  %vm62_vm1 = vcmask 261120   ;;  %s226_s24 = smov [#allocation8]  }
   0xe   :  { %53 = vst.msk [vmem:[#allocation2 + $0x8] sm:$0xff] %vm51_vm0, %v225_v0  ;;  %v57_v6 = vld [vmem:[#allocation3 + $0x8] sm:$0xff]  ;;  %v142_v13 = vld [vmem:[%s276_s2] ss:$0 sm:$0xff]  ;;  %s114_s25 = sshll.u32 %s226_s24, 4  ;;  %s116_s28 = sshll.u32 %s277_s3, 4  ;;  %s115_s25 = int_to_ptr.vmem [resolvable:$true] %s114_s25  ;;  %s117_s28 = int_to_ptr.hbm [resolvable:$true] %s116_s28 }
   0xf   :  { %82 = vmatpush.msra.mxu0 %v60_v2  ;;  %133 = vmatpush.msra.mxu1 %v60_v2 }
  0x11   :  { %83 = vmatpush.msra.mxu0 %v59_v3  ;;  %134 = vmatpush.msra.mxu1 %v59_v3 }
  0x13   :  { %84 = vmatpush.msra.mxu0 %v58_v4  ;;  %135 = vmatpush.msra.mxu1 %v58_v4 }
  0x14   :  { %130 = vmatmul.msk.f32.vlgmr.msra.gmra.mxu0 %vm62_vm1, %v56_v5  ;;  %131 = vmatmul.msk.f32.vlgmr.msra.gmra.mxu1 %vm62_vm1, %v57_v6  ;;  %v54_v7 = vld [vmem:[#allocation2] sm:$0xff] }
  0x15   :  { %v55_v8 = vld [vmem:[#allocation2 + $0x8] sm:$0xff] }
  0x91   :  { %v86_v9 = vpop.f32.mrf.mxu0  ;;  %v89_v10 = vpop.f32.mrf.mxu1 }
  0x92   :  { %v92_v11 = vadd.f32 %v86_v9, %v54_v7  ;;  %v93_v12 = vadd.f32 %v89_v10, %v55_v8 }
  0x94   :  { %95 = vst.msk [vmem:[#allocation2] sm:$0xff] %vm51_vm0, %v92_v11 }
  0x95   :  { %96 = vst.msk [vmem:[#allocation2 + $0x8] sm:$0xff] %vm51_vm0, %v93_v12 }
  0x9b   :  { %v100_v14 = vld [vmem:[#allocation2] sm:$0xff] }
  0x9c   :  { %v101_v15 = vld [vmem:[#allocation2 + $0x8] sm:$0xff]  ;;  %v106_v16 = vadd.f32 %v142_v13, %v100_v14 }
  0x9d   :  { %v107_v17 = vadd.f32 %v142_v13, %v101_v15 }
  0x9e   :  { %108 = vst.msk [vmem:[#allocation8] sm:$0xff] %vm51_vm0, %v106_v16 }
  0x9f   :  { %109 = vst.msk [vmem:[#allocation8 + $0x8] sm:$0xff] %vm51_vm0, %v107_v17 }
  0xa0   :  { %122 = dma.vmem_to_hbm [thread:$0]  %s115_s25, 256, %s117_s28, [#allocation5], %s222_s20, %s222_s20, %s223_s21  }
  0xa1   :  { %219 = dma.done.wait [#allocation5], 256  }
  0xa2   :  { %220 = vsyncadd [#allocation5], 4294967040 }
  0xa3   :  { %127 = vsyncpa [#allocation4], 1 }
  0xa4   :  { %128 = vsyncpa [#allocation7], 1 }
  0xa5   :  { %129 = vsyncpa [#allocation5], 1 }

</bundles_post_ra>
